<compile_context>
chip_gen: v7x
topology: tpu7x:2x2x1
jax: 0.10.0
libtpu: 0.0.40
codegen_flags: <defaults>
</compile_context>

<pallas_src>
import functools
import math

import jax
import jax.numpy as jnp
from jax.experimental import pallas as pl
from jax.experimental.pallas import tpu as pltpu

EPS = 1e-06
LOG_SIG_MAX = 1.38
LOG_SIG_MIN = -9.21
HIDDEN = 256
LOG_2PI = math.log(2.0 * math.pi)


def _round_up(x, m):
    return ((x + m - 1) // m) * m


def _pick_tile(batch):
    # 16-row multiple (fully packed bf16 sublanes), capped at 128 rows:
    #   * M=128 saturates the MXU on v5e (4x128^2) and keeps the f32 tail's
    #     vreg live set roughly half of what tile=256 needs,
    #   * cdiv(batch, 2) guarantees >= 2 grid steps once batch >= 32 so the
    #     "parallel" batch axis shards across both v7x TensorCores.
    return min(128, _round_up(pl.cdiv(batch, 2), 16))


def _policy_kernel(action_scale, action_bias, action_size,
                   x_ref,
                   w1_ref, b1_ref, w2_ref, b2_ref,
                   w3_ref, b3_ref, w4_ref, b4_ref,
                   wh_ref, bh_ref,
                   eps_ref,
                   out_ref):
    A = action_size
    out_dtype = out_ref.dtype

    def layer(h, w_ref, b_ref):
        z = jnp.dot(h, w_ref[...], preferred_element_type=jnp.float32) + b_ref[...]
        # ReLU in f32, re-cast to bf16 for the next MXU matmul.
        return jnp.maximum(z, 0.0).astype(jnp.bfloat16)

    # 4-layer MLP with ReLU; x is f32 in HBM, cast to bf16 in-VMEM (VPU op
    # fully hidden under the matmuls).
    h = layer(x_ref[...].astype(jnp.bfloat16), w1_ref, b1_ref)
    h = layer(h, w2_ref, b2_ref)
    h = layer(h, w3_ref, b3_ref)
    h = layer(h, w4_ref, b4_ref)

    # Fused mean / log_std head, zero-padded to a full 128-lane output group so
    # `heads` is lane-dense and mean / log_std are clean lane slices.
    heads = jnp.dot(h, wh_ref[...], preferred_element_type=jnp.float32) + bh_ref[...]
    mean = heads[:, :A]
    log_std = jnp.clip(heads[:, A:2 * A], LOG_SIG_MIN, LOG_SIG_MAX)

    # Zero the whole output tile once (makes the pad lanes deterministic); the
    # useful lanes are overwritten by the slice stores below.
    out_ref[...] = jnp.zeros_like(out_ref)

    eps = eps_ref[...]
    std = jnp.exp(log_std)
    x_t = mean + std * eps            # reparameterized sample
    y_t = jnp.tanh(x_t)

    # Direct slice stores as soon as each result is ready (shortens f32 live
    # ranges; avoids the lane-concat shuffles + extra (tile,128) temp).
    out_ref[:, 0:A] = (y_t * action_scale + action_bias).astype(out_dtype)                  # action
    out_ref[:, A:2 * A] = (jnp.tanh(mean) * action_scale + action_bias).astype(out_dtype)   # squashed mean
    out_ref[:, 2 * A:3 * A] = log_std.astype(out_dtype)                                     # clamped log_std

    # Normal(mean, std).log_prob(x_t) with (x_t - mean)/std == eps (no divide),
    # then the tanh change-of-variables correction with the exact EPS floor of
    # the PyTorch reference.
    logp = -0.5 * (eps * eps) - log_std - 0.5 * LOG_2PI
    logp = logp - jnp.log(action_scale * (1.0 - y_t * y_t) + EPS)
    out_ref[:, 3 * A:3 * A + 1] = jnp.sum(logp, axis=1, keepdims=True).astype(out_dtype)


def init_policy_params(key, state_dim, action_size):
    """PyTorch-nn.Linear-style uniform init: U(-1/sqrt(fan_in), 1/sqrt(fan_in))."""
    dims = [(state_dim, HIDDEN), (HIDDEN, HIDDEN), (HIDDEN, HIDDEN), (HIDDEN, HIDDEN),
            (HIDDEN, action_size), (HIDDEN, action_size)]
    params = []
    for (fan_in, fan_out) in dims:
        key, kw, kb = jax.random.split(key, 3)
        bound = 1.0 / math.sqrt(fan_in)
        w = jax.random.uniform(kw, (fan_in, fan_out), jnp.float32, -bound, bound)
        b = jax.random.uniform(kb, (1, fan_out), jnp.float32, -bound, bound)
        params += [w, b]
    return params


def prepare_policy_params(params, action_size):
    """One-time parameter prep (hoisted out of the per-call path).

    Fuses the mean / log_std projections into one head, zero-pads the head to a
    full 128-lane output group, and casts weights to bf16 (MXU operands) and
    biases to f32 (added post-accumulation).
    """
    w1, b1, w2, b2, w3, b3, w4, b4, wm, bm, ws, bs = params
    A = action_size
    head_width = _round_up(2 * A, 128)
    wh = jnp.zeros((HIDDEN, head_width), jnp.float32)
    wh = wh.at[:, :A].set(wm).at[:, A:2 * A].set(ws)
    bh = jnp.zeros((1, head_width), jnp.float32)
    bh = bh.at[:, :A].set(bm).at[:, A:2 * A].set(bs)

    weights = tuple(w.astype(jnp.bfloat16) for w in (w1, w2, w3, w4, wh))
    biases = tuple(b.astype(jnp.float32) for b in (b1, b2, b3, b4, bh))
    return weights, biases


def policy_forward(inputs, prepared_params, eps, *, state_dim, action_size,
                   max_action_value=1.0, min_action_value=-1.0,
                   deterministic=False, out_dtype=jnp.float32):
    """Forward pass.  Returns (action, log_prob, [tanh(mean)*s+b, log_std], None),
    or just tanh(mean)*s+b if deterministic=True, matching the reference.

    out_dtype=jnp.bfloat16 halves the output writeback (useful on v6e where the
    f32 slab sits at the roofline knee); default f32 matches the reference.
    """
    weights, biases = prepared_params
    A = action_size

    x = jnp.reshape(inputs, (-1, state_dim)).astype(jnp.float32)
    batch = x.shape[0]
    action_scale = (max_action_value - min_action_value) / 2.0
    action_bias = (max_action_value + min_action_value) / 2.0

    tile = _pick_tile(batch)
    batch_p = _round_up(batch, tile)
    eps = eps.astype(jnp.float32)
    if batch_p != batch:
        x = jnp.pad(x, ((0, batch_p - batch), (0, 0)))
        eps = jnp.pad(eps, ((0, batch_p - batch), (0, 0)))

    slab_width = _round_up(3 * A + 1, 128)
    grid = (batch_p // tile,)

    def row_map(i):
        return (i, 0)

    def const_map(i):
        return (0, 0)

    # Weights / biases use constant index_maps -> VMEM-resident across grid
    # steps (DMA'd once per call, ~0.5 MB total).
    in_specs = [pl.BlockSpec((tile, state_dim), row_map)]
    flat_in = [x]
    for w, b in zip(weights, biases):
        in_specs.append(pl.BlockSpec(w.shape, const_map))
        in_specs.append(pl.BlockSpec(b.shape, const_map))
        flat_in += [w, b]
    in_specs.append(pl.BlockSpec((tile, A), row_map))
    flat_in.append(eps)

    kernel = functools.partial(_policy_kernel, action_scale, action_bias, A)

    flops = 2 * batch_p * (state_dim * HIDDEN + 3 * HIDDEN * HIDDEN
                           + HIDDEN * weights[-1].shape[1])
    bytes_accessed = int(sum(a.size * a.dtype.itemsize for a in flat_in)
                         + batch_p * slab_width * jnp.dtype(out_dtype).itemsize)
    transcendentals = int(batch_p * 4 * A)  # tanh x2, exp, log per action lane

    slab = pl.pallas_call(
        kernel,
        out_shape=jax.ShapeDtypeStruct((batch_p, slab_width), out_dtype),
        grid=grid,
        in_specs=in_specs,
        out_specs=pl.BlockSpec((tile, slab_width), row_map),
        compiler_params=pltpu.CompilerParams(
            dimension_semantics=("parallel",)),
        cost_estimate=pl.CostEstimate(
            flops=int(flops),
            transcendentals=transcendentals,
            bytes_accessed=bytes_accessed),
    )(*flat_in)

    # Slab layout: [action | tanh(mean)*s+b | log_std | logp_sum | 0-pad]
    if deterministic:
        return slab[:batch, A:2 * A].astype(jnp.float32)

    action = slab[:batch, :A].astype(jnp.float32)
    mean_logstd = slab[:batch, A:3 * A].astype(jnp.float32)   # cat([tanh(mean)*s+b, log_std]) as in the reference
    log_prob = slab[:batch, 3 * A:3 * A + 1].astype(jnp.float32)
    return action, log_prob, mean_logstd, None


if __name__ == "__main__":
    state_dim = 32
    action_size = 4

    key = jax.random.PRNGKey(0)
    k_params, k_inputs, k_eps = jax.random.split(key, 3)

    raw_params = init_policy_params(k_params, state_dim, action_size)
    prepared = prepare_policy_params(raw_params, action_size)   # one-time prep

    # Inputs of shape (2, 4, 32) — reshaped to (-1, state_dim) = (8, 32) inside,
    # exactly like torch.reshape(inputs, (-1, state_dim)).
    inputs = jax.random.normal(k_inputs, (2, 4, state_dim), dtype=jnp.float32)
    batch = inputs.size // state_dim
    eps = jax.random.normal(k_eps, (batch, action_size), dtype=jnp.float32)

    action, log_prob, mean_logstd, _ = policy_forward(
        inputs, prepared, eps, state_dim=state_dim, action_size=action_size)

    det_action = policy_forward(
        inputs, prepared, eps, state_dim=state_dim, action_size=action_size,
        deterministic=True)

    jax.block_until_ready((action, log_prob, mean_logstd, det_action))
    assert action.shape == (batch, action_size)
    assert log_prob.shape == (batch, 1)
    assert mean_logstd.shape == (batch, 2 * action_size)
    assert det_action.shape == (batch, action_size)
    assert bool(jnp.all(jnp.isfinite(action)))
    assert bool(jnp.all(jnp.isfinite(log_prob)))
    assert bool(jnp.all(jnp.isfinite(mean_logstd)))
    assert bool(jnp.allclose(det_action, mean_logstd[:, :action_size]))
    print("KERNEL_OK")
</pallas_src>

<mosaic_0001>
module attributes {stable_mosaic.version = 11 : i64} {
  func.func @_policy_kernel(%arg0: i32, %arg1: memref<16x32xf32, #tpu.memory_space<vmem>>, %arg2: memref<32x256xbf16, #tpu.memory_space<vmem>>, %arg3: memref<1x256xf32, #tpu.memory_space<vmem>>, %arg4: memref<256x256xbf16, #tpu.memory_space<vmem>>, %arg5: memref<1x256xf32, #tpu.memory_space<vmem>>, %arg6: memref<256x256xbf16, #tpu.memory_space<vmem>>, %arg7: memref<1x256xf32, #tpu.memory_space<vmem>>, %arg8: memref<256x256xbf16, #tpu.memory_space<vmem>>, %arg9: memref<1x256xf32, #tpu.memory_space<vmem>>, %arg10: memref<256x128xbf16, #tpu.memory_space<vmem>>, %arg11: memref<1x128xf32, #tpu.memory_space<vmem>>, %arg12: memref<16x4xf32, #tpu.memory_space<vmem>>, %arg13: memref<16x128xf32, #tpu.memory_space<vmem>>) attributes {dimension_semantics = [#tpu.dimension_semantics<parallel>], iteration_bounds = array<i64: 1>, scalar_prefetch = 0 : i64, scratch_operands = 0 : i64, tpu.core_type = #tpu.core_type<tc>, window_params = [{transform_indices = @transform_0, window_bounds = array<i64: 16, 32>}, {pipeline_mode = #tpu.pipeline_mode<synchronous>, transform_indices = @transform_1, window_bounds = array<i64: 32, 256>}, {pipeline_mode = #tpu.pipeline_mode<synchronous>, transform_indices = @transform_2, window_bounds = array<i64: 1, 256>}, {pipeline_mode = #tpu.pipeline_mode<synchronous>, transform_indices = @transform_3, window_bounds = array<i64: 256, 256>}, {pipeline_mode = #tpu.pipeline_mode<synchronous>, transform_indices = @transform_4, window_bounds = array<i64: 1, 256>}, {pipeline_mode = #tpu.pipeline_mode<synchronous>, transform_indices = @transform_5, window_bounds = array<i64: 256, 256>}, {pipeline_mode = #tpu.pipeline_mode<synchronous>, transform_indices = @transform_6, window_bounds = array<i64: 1, 256>}, {pipeline_mode = #tpu.pipeline_mode<synchronous>, transform_indices = @transform_7, window_bounds = array<i64: 256, 256>}, {pipeline_mode = #tpu.pipeline_mode<synchronous>, transform_indices = @transform_8, window_bounds = array<i64: 1, 256>}, {pipeline_mode = #tpu.pipeline_mode<synchronous>, transform_indices = @transform_9, window_bounds = array<i64: 256, 128>}, {pipeline_mode = #tpu.pipeline_mode<synchronous>, transform_indices = @transform_10, window_bounds = array<i64: 1, 128>}, {transform_indices = @transform_11, window_bounds = array<i64: 16, 4>}, {transform_indices = @transform_12, window_bounds = array<i64: 16, 128>}]} {
    %c0 = arith.constant 0 : index
    %c0_0 = arith.constant 0 : index
    %0 = vector.load %arg1[%c0, %c0_0] : memref<16x32xf32, #tpu.memory_space<vmem>>, vector<16x32xf32>
    %1 = arith.truncf %0 : vector<16x32xf32> to vector<16x32xbf16>
    %c0_1 = arith.constant 0 : index
    %c0_2 = arith.constant 0 : index
    %2 = vector.load %arg2[%c0_1, %c0_2] : memref<32x256xbf16, #tpu.memory_space<vmem>>, vector<32x256xbf16>
    %cst = arith.constant dense<0.000000e+00> : vector<16x256xf32>
    %3 = tpu.matmul %1, %2, %cst {dimension_numbers = #tpu.dot_dimension_numbers<[1], [0], [0], [1], [0, 0, 1, 1], [], []>} : vector<16x32xbf16>, vector<32x256xbf16>, vector<16x256xf32> -> vector<16x256xf32>
    %c0_3 = arith.constant 0 : index
    %c0_4 = arith.constant 0 : index
    %4 = vector.load %arg3[%c0_3, %c0_4] : memref<1x256xf32, #tpu.memory_space<vmem>>, vector<1x256xf32>
    %5 = vector.broadcast %4 : vector<1x256xf32> to vector<16x256xf32>
    %6 = arith.addf %3, %5 : vector<16x256xf32>
    %cst_5 = arith.constant 0.000000e+00 : f32
    %7 = vector.broadcast %cst_5 : f32 to vector<16x256xf32>
    %8 = arith.maximumf %6, %7 : vector<16x256xf32>
    %9 = arith.truncf %8 : vector<16x256xf32> to vector<16x256xbf16>
    %c0_6 = arith.constant 0 : index
    %c0_7 = arith.constant 0 : index
    %10 = vector.load %arg4[%c0_6, %c0_7] : memref<256x256xbf16, #tpu.memory_space<vmem>>, vector<256x256xbf16>
    %cst_8 = arith.constant dense<0.000000e+00> : vector<16x256xf32>
    %11 = tpu.matmul %9, %10, %cst_8 {dimension_numbers = #tpu.dot_dimension_numbers<[1], [0], [0], [1], [0, 0, 1, 1], [], []>} : vector<16x256xbf16>, vector<256x256xbf16>, vector<16x256xf32> -> vector<16x256xf32>
    %c0_9 = arith.constant 0 : index
    %c0_10 = arith.constant 0 : index
    %12 = vector.load %arg5[%c0_9, %c0_10] : memref<1x256xf32, #tpu.memory_space<vmem>>, vector<1x256xf32>
    %13 = vector.broadcast %12 : vector<1x256xf32> to vector<16x256xf32>
    %14 = arith.addf %11, %13 : vector<16x256xf32>
    %cst_11 = arith.constant 0.000000e+00 : f32
    %15 = vector.broadcast %cst_11 : f32 to vector<16x256xf32>
    %16 = arith.maximumf %14, %15 : vector<16x256xf32>
    %17 = arith.truncf %16 : vector<16x256xf32> to vector<16x256xbf16>
    %c0_12 = arith.constant 0 : index
    %c0_13 = arith.constant 0 : index
    %18 = vector.load %arg6[%c0_12, %c0_13] : memref<256x256xbf16, #tpu.memory_space<vmem>>, vector<256x256xbf16>
    %cst_14 = arith.constant dense<0.000000e+00> : vector<16x256xf32>
    %19 = tpu.matmul %17, %18, %cst_14 {dimension_numbers = #tpu.dot_dimension_numbers<[1], [0], [0], [1], [0, 0, 1, 1], [], []>} : vector<16x256xbf16>, vector<256x256xbf16>, vector<16x256xf32> -> vector<16x256xf32>
    %c0_15 = arith.constant 0 : index
    %c0_16 = arith.constant 0 : index
    %20 = vector.load %arg7[%c0_15, %c0_16] : memref<1x256xf32, #tpu.memory_space<vmem>>, vector<1x256xf32>
    %21 = vector.broadcast %20 : vector<1x256xf32> to vector<16x256xf32>
    %22 = arith.addf %19, %21 : vector<16x256xf32>
    %cst_17 = arith.constant 0.000000e+00 : f32
    %23 = vector.broadcast %cst_17 : f32 to vector<16x256xf32>
    %24 = arith.maximumf %22, %23 : vector<16x256xf32>
    %25 = arith.truncf %24 : vector<16x256xf32> to vector<16x256xbf16>
    %c0_18 = arith.constant 0 : index
    %c0_19 = arith.constant 0 : index
    %26 = vector.load %arg8[%c0_18, %c0_19] : memref<256x256xbf16, #tpu.memory_space<vmem>>, vector<256x256xbf16>
    %cst_20 = arith.constant dense<0.000000e+00> : vector<16x256xf32>
    %27 = tpu.matmul %25, %26, %cst_20 {dimension_numbers = #tpu.dot_dimension_numbers<[1], [0], [0], [1], [0, 0, 1, 1], [], []>} : vector<16x256xbf16>, vector<256x256xbf16>, vector<16x256xf32> -> vector<16x256xf32>
    %c0_21 = arith.constant 0 : index
    %c0_22 = arith.constant 0 : index
    %28 = vector.load %arg9[%c0_21, %c0_22] : memref<1x256xf32, #tpu.memory_space<vmem>>, vector<1x256xf32>
    %29 = vector.broadcast %28 : vector<1x256xf32> to vector<16x256xf32>
    %30 = arith.addf %27, %29 : vector<16x256xf32>
    %cst_23 = arith.constant 0.000000e+00 : f32
    %31 = vector.broadcast %cst_23 : f32 to vector<16x256xf32>
    %32 = arith.maximumf %30, %31 : vector<16x256xf32>
    %33 = arith.truncf %32 : vector<16x256xf32> to vector<16x256xbf16>
    %c0_24 = arith.constant 0 : index
    %c0_25 = arith.constant 0 : index
    %34 = vector.load %arg10[%c0_24, %c0_25] : memref<256x128xbf16, #tpu.memory_space<vmem>>, vector<256x128xbf16>
    %cst_26 = arith.constant dense<0.000000e+00> : vector<16x128xf32>
    %35 = tpu.matmul %33, %34, %cst_26 {dimension_numbers = #tpu.dot_dimension_numbers<[1], [0], [0], [1], [0, 0, 1, 1], [], []>} : vector<16x256xbf16>, vector<256x128xbf16>, vector<16x128xf32> -> vector<16x128xf32>
    %c0_27 = arith.constant 0 : index
    %c0_28 = arith.constant 0 : index
    %36 = vector.load %arg11[%c0_27, %c0_28] : memref<1x128xf32, #tpu.memory_space<vmem>>, vector<1x128xf32>
    %37 = vector.broadcast %36 : vector<1x128xf32> to vector<16x128xf32>
    %38 = arith.addf %35, %37 : vector<16x128xf32>
    %39 = vector.extract_strided_slice %38 {offsets = [0, 0], sizes = [16, 4], strides = [1, 1]} : vector<16x128xf32> to vector<16x4xf32>
    %40 = vector.extract_strided_slice %38 {offsets = [0, 4], sizes = [16, 4], strides = [1, 1]} : vector<16x128xf32> to vector<16x4xf32>
    %cst_29 = arith.constant -9.210000e+00 : f32
    %cst_30 = arith.constant 1.380000e+00 : f32
    %41 = vector.broadcast %cst_29 : f32 to vector<16x4xf32>
    %42 = arith.maximumf %41, %40 : vector<16x4xf32>
    %43 = vector.broadcast %cst_30 : f32 to vector<16x4xf32>
    %44 = arith.minimumf %43, %42 : vector<16x4xf32>
    %cst_31 = arith.constant 0.000000e+00 : f32
    %45 = vector.broadcast %cst_31 : f32 to vector<16x128xf32>
    %c0_32 = arith.constant 0 : index
    %c0_33 = arith.constant 0 : index
    %46 = vector.load %arg13[%c0_32, %c0_33] : memref<16x128xf32, #tpu.memory_space<vmem>>, vector<16x128xf32>
    tpu.vector_store %arg13[%c0_32, %c0_33], %45 {strides = array<i32>} : memref<16x128xf32, #tpu.memory_space<vmem>>, vector<16x128xf32>,
    %c0_34 = arith.constant 0 : index
    %c0_35 = arith.constant 0 : index
    %47 = vector.load %arg12[%c0_34, %c0_35] : memref<16x4xf32, #tpu.memory_space<vmem>>, vector<16x4xf32>
    %48 = math.exp %44 : vector<16x4xf32>
    %49 = arith.mulf %48, %47 : vector<16x4xf32>
    %50 = arith.addf %39, %49 : vector<16x4xf32>
    %51 = math.tanh %50 : vector<16x4xf32>
    %cst_36 = arith.constant 1.000000e+00 : f32
    %52 = vector.broadcast %cst_36 : f32 to vector<16x4xf32>
    %53 = arith.mulf %51, %52 : vector<16x4xf32>
    %cst_37 = arith.constant 0.000000e+00 : f32
    %54 = vector.broadcast %cst_37 : f32 to vector<16x4xf32>
    %55 = arith.addf %53, %54 : vector<16x4xf32>
    %c0_38 = arith.constant 0 : index
    %c0_39 = arith.constant 0 : index
    %56 = vector.load %arg13[%c0_38, %c0_39] : memref<16x128xf32, #tpu.memory_space<vmem>>, vector<16x4xf32>
    tpu.vector_store %arg13[%c0_38, %c0_39], %55 {strides = array<i32>} : memref<16x128xf32, #tpu.memory_space<vmem>>, vector<16x4xf32>,
    %57 = math.tanh %39 : vector<16x4xf32>
    %cst_40 = arith.constant 1.000000e+00 : f32
    %58 = vector.broadcast %cst_40 : f32 to vector<16x4xf32>
    %59 = arith.mulf %57, %58 : vector<16x4xf32>
    %cst_41 = arith.constant 0.000000e+00 : f32
    %60 = vector.broadcast %cst_41 : f32 to vector<16x4xf32>
    %61 = arith.addf %59, %60 : vector<16x4xf32>
    %c0_42 = arith.constant 0 : index
    %c4 = arith.constant 4 : index
    %62 = vector.load %arg13[%c0_42, %c4] : memref<16x128xf32, #tpu.memory_space<vmem>>, vector<16x4xf32>
    tpu.vector_store %arg13[%c0_42, %c4], %61 {strides = array<i32>} : memref<16x128xf32, #tpu.memory_space<vmem>>, vector<16x4xf32>,
    %c0_43 = arith.constant 0 : index
    %c8 = arith.constant 8 : index
    %63 = vector.load %arg13[%c0_43, %c8] : memref<16x128xf32, #tpu.memory_space<vmem>>, vector<16x4xf32>
    tpu.vector_store %arg13[%c0_43, %c8], %44 {strides = array<i32>} : memref<16x128xf32, #tpu.memory_space<vmem>>, vector<16x4xf32>,
    %64 = arith.mulf %47, %47 : vector<16x4xf32>
    %cst_44 = arith.constant -5.000000e-01 : f32
    %65 = vector.broadcast %cst_44 : f32 to vector<16x4xf32>
    %66 = arith.mulf %65, %64 : vector<16x4xf32>
    %67 = arith.subf %66, %44 : vector<16x4xf32>
    %cst_45 = arith.constant 0.918938517 : f32
    %68 = vector.broadcast %cst_45 : f32 to vector<16x4xf32>
    %69 = arith.subf %67, %68 : vector<16x4xf32>
    %70 = arith.mulf %51, %51 : vector<16x4xf32>
    %cst_46 = arith.constant 1.000000e+00 : f32
    %71 = vector.broadcast %cst_46 : f32 to vector<16x4xf32>
    %72 = arith.subf %71, %70 : vector<16x4xf32>
    %cst_47 = arith.constant 1.000000e+00 : f32
    %73 = vector.broadcast %cst_47 : f32 to vector<16x4xf32>
    %74 = arith.mulf %73, %72 : vector<16x4xf32>
    %cst_48 = arith.constant 9.99999997E-7 : f32
    %75 = vector.broadcast %cst_48 : f32 to vector<16x4xf32>
    %76 = arith.addf %74, %75 : vector<16x4xf32>
    %77 = math.log %76 : vector<16x4xf32>
    %78 = arith.subf %69, %77 : vector<16x4xf32>
    %cst_49 = arith.constant dense<0.000000e+00> : vector<16xf32>
    %79 = vector.multi_reduction <add>, %78, %cst_49 [1] : vector<16x4xf32> to vector<16xf32>
    %80 = vector.shape_cast %79 : vector<16xf32> to vector<16x1xf32>
    %c0_50 = arith.constant 0 : index
    %c12 = arith.constant 12 : index
    %81 = vector.load %arg13[%c0_50, %c12] : memref<16x128xf32, #tpu.memory_space<vmem>>, vector<16x1xf32>
    tpu.vector_store %arg13[%c0_50, %c12], %80 {strides = array<i32>} : memref<16x128xf32, #tpu.memory_space<vmem>>, vector<16x1xf32>,
    return
  }
  func.func @transform_0(%arg0: i32) -> (i32, i32) {
    %c0_i32 = arith.constant 0 : i32
    %c0_i32_0 = arith.constant 0 : i32
    return %arg0, %c0_i32 : i32, i32
  }
  func.func @transform_1(%arg0: i32) -> (i32, i32) {
    %c0_i32 = arith.constant 0 : i32
    %c0_i32_0 = arith.constant 0 : i32
    %c0_i32_1 = arith.constant 0 : i32
    return %c0_i32, %c0_i32_0 : i32, i32
  }
  func.func @transform_2(%arg0: i32) -> (i32, i32) {
    %c0_i32 = arith.constant 0 : i32
    %c0_i32_0 = arith.constant 0 : i32
    %c0_i32_1 = arith.constant 0 : i32
    return %c0_i32, %c0_i32_0 : i32, i32
  }
  func.func @transform_3(%arg0: i32) -> (i32, i32) {
    %c0_i32 = arith.constant 0 : i32
    %c0_i32_0 = arith.constant 0 : i32
    %c0_i32_1 = arith.constant 0 : i32
    return %c0_i32, %c0_i32_0 : i32, i32
  }
  func.func @transform_4(%arg0: i32) -> (i32, i32) {
    %c0_i32 = arith.constant 0 : i32
    %c0_i32_0 = arith.constant 0 : i32
    %c0_i32_1 = arith.constant 0 : i32
    return %c0_i32, %c0_i32_0 : i32, i32
  }
  func.func @transform_5(%arg0: i32) -> (i32, i32) {
    %c0_i32 = arith.constant 0 : i32
    %c0_i32_0 = arith.constant 0 : i32
    %c0_i32_1 = arith.constant 0 : i32
    return %c0_i32, %c0_i32_0 : i32, i32
  }
  func.func @transform_6(%arg0: i32) -> (i32, i32) {
    %c0_i32 = arith.constant 0 : i32
    %c0_i32_0 = arith.constant 0 : i32
    %c0_i32_1 = arith.constant 0 : i32
    return %c0_i32, %c0_i32_0 : i32, i32
  }
  func.func @transform_7(%arg0: i32) -> (i32, i32) {
    %c0_i32 = arith.constant 0 : i32
    %c0_i32_0 = arith.constant 0 : i32
    %c0_i32_1 = arith.constant 0 : i32
    return %c0_i32, %c0_i32_0 : i32, i32
  }
  func.func @transform_8(%arg0: i32) -> (i32, i32) {
    %c0_i32 = arith.constant 0 : i32
    %c0_i32_0 = arith.constant 0 : i32
    %c0_i32_1 = arith.constant 0 : i32
    return %c0_i32, %c0_i32_0 : i32, i32
  }
  func.func @transform_9(%arg0: i32) -> (i32, i32) {
    %c0_i32 = arith.constant 0 : i32
    %c0_i32_0 = arith.constant 0 : i32
    %c0_i32_1 = arith.constant 0 : i32
    return %c0_i32, %c0_i32_0 : i32, i32
  }
  func.func @transform_10(%arg0: i32) -> (i32, i32) {
    %c0_i32 = arith.constant 0 : i32
    %c0_i32_0 = arith.constant 0 : i32
    %c0_i32_1 = arith.constant 0 : i32
    return %c0_i32, %c0_i32_0 : i32, i32
  }
  func.func @transform_11(%arg0: i32) -> (i32, i32) {
    %c0_i32 = arith.constant 0 : i32
    %c0_i32_0 = arith.constant 0 : i32
    return %arg0, %c0_i32 : i32, i32
  }
  func.func @transform_12(%arg0: i32) -> (i32, i32) {
    %c0_i32 = arith.constant 0 : i32
    %c0_i32_0 = arith.constant 0 : i32
    return %arg0, %c0_i32 : i32, i32
  }
}

</mosaic_0001>

<bundles_post_ra>
// kernel: tpu_custom_call.1
= control target key start
LH: loop header
LB: loop body
LE: loop exit
PB: predicated region body
PF: predicated region fallthrough
CT: control target
= control target key end

     0   :  { %17 = vsyncpa [#allocation3], 0  ;;  %s1983_s0 = inlined_call_operand.vmem [shape: f32[16,32], index: 0, kind: input, shape index: {}]   ;;  %s1984_s1 = inlined_call_operand.hbm [shape: bf16[32,256], index: 1, kind: input, shape index: {}]   ;;  %s1985_s2 = inlined_call_operand.vmem [shape: f32[1,256], index: 2, kind: input, shape index: {}]   ;;  %s1986_s3 = inlined_call_operand.hbm [shape: bf16[256,256], index: 3, kind: input, shape index: {}]   ;;  %s1987_s4 = inlined_call_operand.vmem [shape: f32[1,256], index: 4, kind: input, shape index: {}]   ;;  %s1988_s5 = inlined_call_operand.hbm [shape: bf16[256,256], index: 5, kind: input, shape index: {}]   ;;  %s1989_s6 = inlined_call_operand.vmem [shape: f32[1,256], index: 6, kind: input, shape index: {}]   ;;  %s1990_s7 = inlined_call_operand.hbm [shape: bf16[256,256], index: 7, kind: input, shape index: {}]   ;;  %s1991_s8 = inlined_call_operand.vmem [shape: f32[1,256], index: 8, kind: input, shape index: {}]   ;;  %s1992_s9 = inlined_call_operand.hbm [shape: bf16[256,128], index: 9, kind: input, shape index: {}]   ;;  %s1993_s10 = inlined_call_operand.vmem [shape: f32[1,128], index: 10, kind: input, shape index: {}]   ;;  %s1994_s11 = inlined_call_operand.vmem [shape: f32[16,4], index: 11, kind: input, shape index: {}]   ;;  %s1995_s12 = inlined_call_operand.hbm [shape: f32[16,128], index: 12, kind: output, shape index: {}]  }
   0x1   :  { %18 = vsyncpa [#allocation6], 0 }
   0x2   :  { %19 = vsyncpa [#allocation9], 0 }
   0x3   :  { %20 = vsyncpa [#allocation4], 0  ;;  %s1734_s21 = smov [#allocation5]   ;;  %s1735_s23 = smov [#allocation8]  }
   0x4   :  { %s42_s22 = sshll.u32 %s1734_s21, 4  ;;  %s70_s24 = sshll.u32 %s1735_s23, 4  ;;  %s43_s22 = int_to_ptr.vmem [resolvable:$true] %s42_s22  ;;  %s1812_s24 = int_to_ptr.vmem [resolvable:$true] %s70_s24 }
   0x5   :  { %s1594_s27 = scalar_lea.hbm %s1986_s3, 4096 }
   0x6   :  { %p1595_p0 = scmp.ne.s32.totalorder %s1986_s3, %s1594_s27  ;;  %p1598_p1 = scmp.lt.u32.totalorder %s1594_s27, %s1986_s3 }
   0x8   :  { %p1600_p2 = pnand %p1598_p1, %p1595_p0 }
   0xa   :  { %1603 = shalt.err (!%p1600_p2)
}
   0xb   :  { %s1604_s14 = scalar_lea.vmem %s43_s22, 4096  ;;  %p1609_p4 = scmp.lt.s32.totalorder %s43_s22, %s43_s22 }
   0xc   :  { %p1605_p3 = scmp.ne.s32.totalorder %s43_s22, %s1604_s14  ;;  %p1610_p5 = scmp.lt.s32.totalorder %s1604_s14, %s1604_s14 }
   0xe   :  { %p1611_p6 = por %p1610_p5, %p1609_p4 }
  0x10   :  { %p1612_p7 = pnand %p1611_p6, %p1605_p3 }
  0x12   :  { %1615 = shalt.err (!%p1612_p7)
}
  0x13   :  { %s1736_s15 = smov 128   ;;  %s1737_s16 = smov 8  }
  0x14   :  { %48 = dma.hbm_to_vmem [thread:$0]  %s1986_s3, 4096, %s43_s22, [#allocation6], %s1736_s15, %s1736_s15, %s1737_s16  }
  0x15   :  { %s1616_s21 = scalar_lea.hbm %s1990_s7, 4096 }
  0x16   :  { %p1617_p8 = scmp.ne.s32.totalorder %s1990_s7, %s1616_s21  ;;  %p1620_p9 = scmp.lt.u32.totalorder %s1616_s21, %s1990_s7 }
  0x18   :  { %p1622_p10 = pnand %p1620_p9, %p1617_p8 }
  0x1a   :  { %1625 = shalt.err (!%p1622_p10)
}
  0x1b   :  { %s1626_s28 = scalar_lea.vmem %s1812_s24, 4096  ;;  %p1631_p12 = scmp.lt.s32.totalorder %s1812_s24, %s1812_s24 }
  0x1c   :  { %p1627_p11 = scmp.ne.s32.totalorder %s1812_s24, %s1626_s28  ;;  %p1632_p13 = scmp.lt.s32.totalorder %s1626_s28, %s1626_s28 }
  0x1e   :  { %p1633_p0 = por %p1632_p13, %p1631_p12 }
  0x20   :  { %p1634_p1 = pnand %p1633_p0, %p1627_p11 }
  0x22   :  { %1637 = shalt.err (!%p1634_p1)
}
  0x23   :  { %76 = dma.hbm_to_vmem [thread:$0]  %s1990_s7, 4096, %s1812_s24, [#allocation9], %s1736_s15, %s1736_s15, %s1737_s16  }
  0x24   :  { %s1738_s29 = smov [#allocation2]   ;;  %s1739_s13 = smov [#allocation7]  }
  0x25   :  { %s28_s30 = sshll.u32 %s1738_s29, 4  ;;  %s56_s14 = sshll.u32 %s1739_s13, 4  ;;  %s29_s30 = int_to_ptr.vmem [resolvable:$true] %s28_s30  ;;  %s1849_s14 = int_to_ptr.vmem [resolvable:$true] %s56_s14 }
  0x26   :  { %s1638_s19 = scalar_lea.hbm %s1984_s1, 512 }
  0x27   :  { %p1639_p2 = scmp.ne.s32.totalorder %s1984_s1, %s1638_s19  ;;  %p1642_p3 = scmp.lt.u32.totalorder %s1638_s19, %s1984_s1 }
  0x29   :  { %p1644_p4 = pnand %p1642_p3, %p1639_p2 }
  0x2b   :  { %1647 = shalt.err (!%p1644_p4)
}
  0x2c   :  { %s1648_s7 = scalar_lea.vmem %s29_s30, 512  ;;  %p1653_p6 = scmp.lt.s32.totalorder %s29_s30, %s29_s30 }
  0x2d   :  { %p1649_p5 = scmp.ne.s32.totalorder %s29_s30, %s1648_s7  ;;  %p1654_p7 = scmp.lt.s32.totalorder %s1648_s7, %s1648_s7 }
  0x2f   :  { %p1655_p8 = por %p1654_p7, %p1653_p6 }
  0x31   :  { %p1656_p9 = pnand %p1655_p8, %p1649_p5 }
  0x33   :  { %1659 = shalt.err (!%p1656_p9)
}
  0x34   :  { %34 = dma.hbm_to_vmem [thread:$0]  %s1984_s1, 512, %s29_s30, [#allocation3], %s1736_s15, %s1736_s15, %s1737_s16  }
  0x35   :  { %s1660_s3 = scalar_lea.hbm %s1988_s5, 4096 }
  0x36   :  { %p1661_p10 = scmp.ne.s32.totalorder %s1988_s5, %s1660_s3  ;;  %p1664_p11 = scmp.lt.u32.totalorder %s1660_s3, %s1988_s5 }
  0x38   :  { %p1666_p12 = pnand %p1664_p11, %p1661_p10 }
  0x3a   :  { %1669 = shalt.err (!%p1666_p12)
}
  0x3b   :  { %s1670_s18 = scalar_lea.vmem %s1849_s14, 4096  ;;  %p1675_p0 = scmp.lt.s32.totalorder %s1849_s14, %s1849_s14 }
  0x3c   :  { %p1671_p13 = scmp.ne.s32.totalorder %s1849_s14, %s1670_s18  ;;  %p1676_p1 = scmp.lt.s32.totalorder %s1670_s18, %s1670_s18 }
  0x3e   :  { %p1677_p2 = por %p1676_p1, %p1675_p0 }
  0x40   :  { %p1678_p3 = pnand %p1677_p2, %p1671_p13 }
  0x42   :  { %1681 = shalt.err (!%p1678_p3)
}
  0x43   :  { %62 = dma.hbm_to_vmem [thread:$0]  %s1988_s5, 4096, %s1849_s14, [#allocation6], %s1736_s15, %s1736_s15, %s1737_s16  }
  0x44   :  { %s1740_s19 = smov [#allocation10]   ;;  %s1682_s25 = scalar_lea.hbm %s1992_s9, 2048 }
  0x45   :  { %s84_s20 = sshll.u32 %s1740_s19, 4  ;;  %p1683_p4 = scmp.ne.s32.totalorder %s1992_s9, %s1682_s25  ;;  %s85_s20 = int_to_ptr.vmem [resolvable:$true] %s84_s20 }
  0x46   :  { %p1686_p5 = scmp.lt.u32.totalorder %s1682_s25, %s1992_s9 }
  0x48   :  { %p1688_p6 = pnand %p1686_p5, %p1683_p4 }
  0x4a   :  { %1691 = shalt.err (!%p1688_p6)
}
  0x4b   :  { %s1692_s28 = scalar_lea.vmem %s85_s20, 2048  ;;  %p1697_p8 = scmp.lt.s32.totalorder %s85_s20, %s85_s20 }
  0x4c   :  { %p1693_p7 = scmp.ne.s32.totalorder %s85_s20, %s1692_s28  ;;  %p1698_p9 = scmp.lt.s32.totalorder %s1692_s28, %s1692_s28 }
  0x4e   :  { %p1699_p10 = por %p1698_p9, %p1697_p8 }
  0x50   :  { %p1700_p11 = pnand %p1699_p10, %p1693_p7 }
  0x52   :  { %1703 = shalt.err (!%p1700_p11)
}
  0x53   :  { %s1741_s5 = smov 64   ;;  %s1742_s14 = smov 4  }
  0x54   :  { %90 = dma.hbm_to_vmem [thread:$0]  %s1992_s9, 2048, %s85_s20, [#allocation9], %s1741_s5, %s1741_s5, %s1742_s14  }
  0x55   :  { %1726 = dma.done.wait [#allocation3], 512  }
  0x56   :  { %1727 = vsyncadd [#allocation3], 4294966784 }
  0x57   :  { %1728 = dma.done.wait [#allocation6], 8192  }
  0x58   :  { %1729 = vsyncadd [#allocation6], 4294959104 }
  0x59   :  { %1730 = dma.done.wait [#allocation9], 6144  }
  0x5a   :  { %1731 = vsyncadd [#allocation9], 4294961152  ;;  %v1743_v0 = vmov 0   ;;  %v1412_v1 = vld [vmem:[#allocation2 + $0x4] ss:$8 sps:$4 sm:$0xff]   ;;  %vm150_vm0 = vcmask 261120  }
  0x5b   :  { %186 = vmatprep.mubr.bf16.mxu0 %v1743_v0  ;;  %v1414_v2 = vld [vmem:[#allocation2] ss:$8 sps:$4 sm:$0xff]   ;;  %154 = vmatprep.subr.bf16.mxu0 %v1412_v1  ;;  %v1415_v3 = vld [vmem:[#allocation2 + $0x14] ss:$8 sps:$4 sm:$0xff]   ;;  %v1417_v4 = vld [vmem:[#allocation2 + $0x10] ss:$8 sps:$4 sm:$0xff]  }
  0x5c   :  { %v111_v5 = vld [vmem:[%s1983_s0] sm:$0xff]  ;;  %155 = vmatpush1.bf16.msra.mxu0 %v1414_v2  ;;  %v112_v6 = vld [vmem:[%s1983_s0 + $0x8] sm:$0xff]  ;;  %v1421_v9 = vld [vmem:[#allocation5 + $0x14] ss:$8 sps:$4 sm:$0xff]   ;;  %s1744_s7 = smov 124   ;;  %vm1174_vm1 = vcmask 31744  }
  0x5d   :  { %156 = vmatprep.subr.bf16.mxu0 %v1415_v3  ;;  %v1418_v7 = vld [vmem:[#allocation5 + $0x4] ss:$8 sps:$4 sm:$0xff]   ;;  %v1420_v8 = vld [vmem:[#allocation5] ss:$8 sps:$4 sm:$0xff]   ;;  %v113_v10 = vpack.c.bf16 %v112_v6, %v111_v5  ;;  %v1423_v11 = vld [vmem:[#allocation5 + $0x10] ss:$8 sps:$4 sm:$0xff]  }
  0x5e   :  { %407 = vmatprep.subr.bf16.mxu1 %v1418_v7  ;;  %v1424_v12 = vld [vmem:[#allocation5 + $0x24] ss:$8 sps:$4 sm:$0xff]   ;;  %v1426_v13 = vld [vmem:[#allocation5 + $0x20] ss:$8 sps:$4 sm:$0xff]   ;;  %v1427_v14 = vld [vmem:[#allocation5 + $0x34] ss:$8 sps:$4 sm:$0xff]  }
  0x5f   :  { %408 = vmatpush1.bf16.msra.mxu1 %v1420_v8  ;;  %v1429_v15 = vld [vmem:[#allocation5 + $0x30] ss:$8 sps:$4 sm:$0xff]   ;;  %v1430_v16 = vld [vmem:[#allocation5 + $0x44] ss:$8 sps:$4 sm:$0xff]   ;;  %v1432_v17 = vld [vmem:[#allocation5 + $0x40] ss:$8 sps:$4 sm:$0xff]  }
  0x60   :  { %157 = vmatpush1.bf16.msra.mxu0 %v1417_v4  ;;  %409 = vmatprep.subr.bf16.mxu1 %v1421_v9  ;;  %v1433_v18 = vld [vmem:[#allocation5 + $0x54] ss:$8 sps:$4 sm:$0xff]   ;;  %v1435_v19 = vld [vmem:[#allocation5 + $0x50] ss:$8 sps:$4 sm:$0xff]   ;;  %v1436_v20 = vld [vmem:[#allocation5 + $0x64] ss:$8 sps:$4 sm:$0xff]   ;;  %v120_v4 = vlaneseq }
  0x61   :  { %v1438_v21 = vld [vmem:[#allocation5 + $0x60] ss:$8 sps:$4 sm:$0xff]   ;;  %v1439_v22 = vld [vmem:[#allocation5 + $0x74] ss:$8 sps:$4 sm:$0xff]   ;;  %v1441_v23 = vld [vmem:[#allocation5 + $0x70] ss:$8 sps:$4 sm:$0xff]  }
  0x62   :  { %v1442_v24 = vld [vmem:[#allocation5 + $0x84] ss:$8 sps:$4 sm:$0xff]   ;;  %v1444_v25 = vld [vmem:[#allocation5 + $0x80] ss:$8 sps:$4 sm:$0xff]   ;;  %v1445_v26 = vld [vmem:[#allocation5 + $0x94] ss:$8 sps:$4 sm:$0xff]  }
  0x63   :  { %1261 = vmatmul.mubr.msk.bf16.vlgmr.msra.gmra.mrb[0].mxu0 %vm150_vm0, %v113_v10  ;;  %410 = vmatpush1.bf16.msra.mxu1 %v1423_v11  ;;  %v1447_v27 = vld [vmem:[#allocation5 + $0x90] ss:$8 sps:$4 sm:$0xff]   ;;  %v1448_v28 = vld [vmem:[#allocation5 + $0xa4] ss:$8 sps:$4 sm:$0xff]   ;;  %v1450_v29 = vld [vmem:[#allocation5 + $0xa0] ss:$8 sps:$4 sm:$0xff]  }
  0x64   :  { %411 = vmatprep.subr.bf16.mxu1 %v1424_v12  ;;  %v1451_v30 = vld [vmem:[#allocation5 + $0xb4] ss:$8 sps:$4 sm:$0xff]   ;;  %v1453_v31 = vld [vmem:[#allocation5 + $0xb0] ss:$8 sps:$4 sm:$0xff]   ;;  %v1454_v32 = vld [vmem:[#allocation5 + $0xc4] ss:$8 sps:$4 sm:$0xff]  }
  0x65   :  { %v1456_v33 = vld [vmem:[#allocation5 + $0xc0] ss:$8 sps:$4 sm:$0xff]   ;;  %v1457_v34 = vld [vmem:[#allocation5 + $0xd4] ss:$8 sps:$4 sm:$0xff]   ;;  %v1459_v35 = vld [vmem:[#allocation5 + $0xd0] ss:$8 sps:$4 sm:$0xff]  }
  0x66   :  { %v1460_v36 = vld [vmem:[#allocation5 + $0xe4] ss:$8 sps:$4 sm:$0xff]   ;;  %v1462_v37 = vld [vmem:[#allocation5 + $0xe0] ss:$8 sps:$4 sm:$0xff]   ;;  %v1463_v38 = vld [vmem:[#allocation5 + $0xf4] ss:$8 sps:$4 sm:$0xff]  }
  0x67   :  { %412 = vmatpush1.bf16.msra.mxu1 %v1426_v13  ;;  %v1465_v39 = vld [vmem:[#allocation5 + $0xf0] ss:$8 sps:$4 sm:$0xff]   ;;  %v1466_v40 = vld [vmem:[#allocation7] ss:$8 sps:$4 sm:$0xff]   ;;  %v1468_v41 = vld [vmem:[#allocation7 + $0x4] ss:$8 sps:$4 sm:$0xff]  }
  0x68   :  { %413 = vmatprep.subr.bf16.mxu1 %v1427_v14  ;;  %v1471_v42 = vld [vmem:[#allocation7 + $0x14] ss:$8 sps:$4 sm:$0xff]   ;;  %660 = vmatprep.subr.bf16.mxu0 %v1468_v41  ;;  %v1469_v43 = vld [vmem:[#allocation7 + $0x10] ss:$8 sps:$4 sm:$0xff]   ;;  %v1474_v44 = vld [vmem:[#allocation7 + $0x24] ss:$8 sps:$4 sm:$0xff]  }
  0x69   :  { %661 = vmatpush1.bf16.msra.mxu0 %v1466_v40  ;;  %v1472_v45 = vld [vmem:[#allocation7 + $0x20] ss:$8 sps:$4 sm:$0xff]   ;;  %v1477_v46 = vld [vmem:[#allocation7 + $0x34] ss:$8 sps:$4 sm:$0xff]   ;;  %v1475_v47 = vld [vmem:[#allocation7 + $0x30] ss:$8 sps:$4 sm:$0xff]  }
  0x6a   :  { %662 = vmatprep.subr.bf16.mxu0 %v1471_v42  ;;  %v1480_v48 = vld [vmem:[#allocation7 + $0x44] ss:$8 sps:$4 sm:$0xff]   ;;  %v1478_v49 = vld [vmem:[#allocation7 + $0x40] ss:$8 sps:$4 sm:$0xff]   ;;  %v1483_v50 = vld [vmem:[#allocation7 + $0x54] ss:$8 sps:$4 sm:$0xff]  }
  0x6b   :  { %414 = vmatpush1.bf16.msra.mxu1 %v1429_v15  ;;  %v1481_v51 = vld [vmem:[#allocation7 + $0x50] ss:$8 sps:$4 sm:$0xff]   ;;  %v1486_v52 = vld [vmem:[#allocation7 + $0x64] ss:$8 sps:$4 sm:$0xff]   ;;  %v1484_v53 = vld [vmem:[#allocation7 + $0x60] ss:$8 sps:$4 sm:$0xff]  }
  0x6c   :  { %415 = vmatprep.subr.bf16.mxu1 %v1430_v16  ;;  %v1489_v54 = vld [vmem:[#allocation7 + $0x74] ss:$8 sps:$4 sm:$0xff]   ;;  %v1487_v55 = vld [vmem:[#allocation7 + $0x70] ss:$8 sps:$4 sm:$0xff]   ;;  %v1492_v56 = vld [vmem:[#allocation7 + $0x84] ss:$8 sps:$4 sm:$0xff]  }
  0x6d   :  { %663 = vmatpush1.bf16.msra.mxu0 %v1469_v43  ;;  %v1490_v57 = vld [vmem:[#allocation7 + $0x80] ss:$8 sps:$4 sm:$0xff]   ;;  %v1495_v58 = vld [vmem:[#allocation7 + $0x94] ss:$8 sps:$4 sm:$0xff]   ;;  %v1493_v59 = vld [vmem:[#allocation7 + $0x90] ss:$8 sps:$4 sm:$0xff]  }
  0x6e   :  { %664 = vmatprep.subr.bf16.mxu0 %v1474_v44  ;;  %v1498_v60 = vld [vmem:[#allocation7 + $0xa4] ss:$8 sps:$4 sm:$0xff]   ;;  %v1496_v61 = vld [vmem:[#allocation7 + $0xa0] ss:$8 sps:$4 sm:$0xff]   ;;  %v1501_v62 = vld [vmem:[#allocation7 + $0xb4] ss:$8 sps:$4 sm:$0xff]  }
  0x6f   :  { %416 = vmatpush1.bf16.msra.mxu1 %v1432_v17  ;;  %v1499_v63 = vld [vmem:[#allocation7 + $0xb0] ss:$8 sps:$4 sm:$0xff]   ;;  %v1504_v0 = vld [vmem:[#allocation7 + $0xc4] ss:$8 sps:$4 sm:$0xff]   ;;  %v1502_v1 = vld [vmem:[#allocation7 + $0xc0] ss:$8 sps:$4 sm:$0xff]  }
  0x70   :  { %417 = vmatprep.subr.bf16.mxu1 %v1433_v18  ;;  %v1507_v2 = vld [vmem:[#allocation7 + $0xd4] ss:$8 sps:$4 sm:$0xff]   ;;  %v1505_v3 = vld [vmem:[#allocation7 + $0xd0] ss:$8 sps:$4 sm:$0xff]   ;;  %v121_v5 = vshrl.u32 %v120_v4, 7  ;;  %vm1189_vm2 = vcmask 64544  }
  0x71   :  { %665 = vmatpush1.bf16.msra.mxu0 %v1472_v45  ;;  %v118_v7 = vld [vmem:[%s1985_s2] sm:$0x3]  ;;  %v1529_v40 = vld [vmem:[#allocation8 + $0x50] ss:$8 sps:$4 sm:$0xff]   ;;  %v1534_v41 = vld [vmem:[#allocation8 + $0x64] ss:$8 sps:$4 sm:$0xff]  }
  0x72   :  { %666 = vmatprep.subr.bf16.mxu0 %v1477_v46  ;;  %v1905_v6 = vsub.s32 0, %v121_v5  ;;  %v1910_v8 = vsub.s32 1, %v121_v5  ;;  %v1532_v42 = vld [vmem:[#allocation8 + $0x60] ss:$8 sps:$4 sm:$0xff]   ;;  %v1537_v43 = vld [vmem:[#allocation8 + $0x74] ss:$8 sps:$4 sm:$0xff]  }
  0x73   :  { %418 = vmatpush1.bf16.msra.mxu1 %v1435_v19  ;;  %v1535_v44 = vld [vmem:[#allocation8 + $0x70] ss:$8 sps:$4 sm:$0xff]   ;;  %v1540_v45 = vld [vmem:[#allocation8 + $0x84] ss:$8 sps:$4 sm:$0xff]   ;;  %v1538_v46 = vld [vmem:[#allocation8 + $0x80] ss:$8 sps:$4 sm:$0xff]  }
  0x74   :  { %419 = vmatprep.subr.bf16.mxu1 %v1436_v20  ;;  %v123_v9 = vrot.slane %v118_v7, %v1905_v6  ;;  %v127_v10 = vrot.slane %v118_v7, %v1910_v8  ;;  %vm1200_vm3 = vcmask 97344   ;;  %vm1235_vm4 = vcmask 105568  }
  0x75   :  { %667 = vmatpush1.bf16.msra.mxu0 %v1475_v47  ;;  %v1543_v47 = vld [vmem:[#allocation8 + $0x94] ss:$8 sps:$4 sm:$0xff]  }
  0x76   :  { %668 = vmatprep.subr.bf16.mxu0 %v1480_v48  ;;  %v1541_v48 = vld [vmem:[#allocation8 + $0x90] ss:$8 sps:$4 sm:$0xff]  }
  0x77   :  { %420 = vmatpush1.bf16.msra.mxu1 %v1438_v21 }
  0x78   :  { %421 = vmatprep.subr.bf16.mxu1 %v1439_v22 }
  0x79   :  { %669 = vmatpush1.bf16.msra.mxu0 %v1478_v49  ;;  %v1546_v49 = vld [vmem:[#allocation8 + $0xa4] ss:$8 sps:$4 sm:$0xff]  }
  0x7a   :  { %670 = vmatprep.subr.bf16.mxu0 %v1483_v50  ;;  %v1544_v50 = vld [vmem:[#allocation8 + $0xa0] ss:$8 sps:$4 sm:$0xff]  }
  0x7b   :  { %422 = vmatpush1.bf16.msra.mxu1 %v1441_v23 }
  0x7c   :  { %423 = vmatprep.subr.bf16.mxu1 %v1442_v24 }
  0x7d   :  { %671 = vmatpush1.bf16.msra.mxu0 %v1481_v51  ;;  %v1549_v51 = vld [vmem:[#allocation8 + $0xb4] ss:$8 sps:$4 sm:$0xff]  }
  0x7e   :  { %672 = vmatprep.subr.bf16.mxu0 %v1486_v52  ;;  %v1547_v52 = vld [vmem:[#allocation8 + $0xb0] ss:$8 sps:$4 sm:$0xff]  }
  0x7f   :  { %424 = vmatpush1.bf16.msra.mxu1 %v1444_v25  ;;  %v1510_v25 = vld [vmem:[#allocation7 + $0xe4] ss:$8 sps:$4 sm:$0xff]  }
  0x80   :  { %425 = vmatprep.subr.bf16.mxu1 %v1445_v26  ;;  %v1508_v26 = vld [vmem:[#allocation7 + $0xe0] ss:$8 sps:$4 sm:$0xff]  }
  0x81   :  { %673 = vmatpush1.bf16.msra.mxu0 %v1484_v53  ;;  %v1552_v53 = vld [vmem:[#allocation8 + $0xc4] ss:$8 sps:$4 sm:$0xff]  }
  0x82   :  { %674 = vmatprep.subr.bf16.mxu0 %v1489_v54  ;;  %v1550_v54 = vld [vmem:[#allocation8 + $0xc0] ss:$8 sps:$4 sm:$0xff]  }
  0x83   :  { %426 = vmatpush1.bf16.msra.mxu1 %v1447_v27  ;;  %v1513_v27 = vld [vmem:[#allocation7 + $0xf4] ss:$8 sps:$4 sm:$0xff]  }
  0x84   :  { %427 = vmatprep.subr.bf16.mxu1 %v1448_v28  ;;  %v1511_v28 = vld [vmem:[#allocation7 + $0xf0] ss:$8 sps:$4 sm:$0xff]  }
  0x85   :  { %675 = vmatpush1.bf16.msra.mxu0 %v1487_v55  ;;  %v1555_v55 = vld [vmem:[#allocation8 + $0xd4] ss:$8 sps:$4 sm:$0xff]  }
  0x86   :  { %676 = vmatprep.subr.bf16.mxu0 %v1492_v56  ;;  %v1553_v56 = vld [vmem:[#allocation8 + $0xd0] ss:$8 sps:$4 sm:$0xff]  }
  0x87   :  { %428 = vmatpush1.bf16.msra.mxu1 %v1450_v29  ;;  %v1514_v29 = vld [vmem:[#allocation8] ss:$8 sps:$4 sm:$0xff]  }
  0x88   :  { %429 = vmatprep.subr.bf16.mxu1 %v1451_v30  ;;  %v1516_v30 = vld [vmem:[#allocation8 + $0x4] ss:$8 sps:$4 sm:$0xff]  }
  0x89   :  { %677 = vmatpush1.bf16.msra.mxu0 %v1490_v57  ;;  %v235_v57 = vld [vmem:[%s1987_s4] sm:$0x3] }
  0x8a   :  { %678 = vmatprep.subr.bf16.mxu0 %v1495_v58  ;;  %v240_v58 = vrot.slane %v235_v57, %v1905_v6 }
  0x8b   :  { %430 = vmatpush1.bf16.msra.mxu1 %v1453_v31  ;;  %v1519_v31 = vld [vmem:[#allocation8 + $0x14] ss:$8 sps:$4 sm:$0xff]  }
  0x8c   :  { %431 = vmatprep.subr.bf16.mxu1 %v1454_v32  ;;  %v1517_v32 = vld [vmem:[#allocation8 + $0x10] ss:$8 sps:$4 sm:$0xff]  }
  0x8d   :  { %679 = vmatpush1.bf16.msra.mxu0 %v1493_v59  ;;  %v244_v59 = vrot.slane %v235_v57, %v1910_v8 }
  0x8e   :  { %680 = vmatprep.subr.bf16.mxu0 %v1498_v60 }
  0x8f   :  { %432 = vmatpush1.bf16.msra.mxu1 %v1456_v33  ;;  %v1522_v33 = vld [vmem:[#allocation8 + $0x24] ss:$8 sps:$4 sm:$0xff]  }
  0x90   :  { %433 = vmatprep.subr.bf16.mxu1 %v1457_v34  ;;  %v1520_v34 = vld [vmem:[#allocation8 + $0x20] ss:$8 sps:$4 sm:$0xff]  }
  0x91   :  { %681 = vmatpush1.bf16.msra.mxu0 %v1496_v61 }
  0x92   :  { %682 = vmatprep.subr.bf16.mxu0 %v1501_v62 }
  0x93   :  { %434 = vmatpush1.bf16.msra.mxu1 %v1459_v35  ;;  %v1525_v35 = vld [vmem:[#allocation8 + $0x34] ss:$8 sps:$4 sm:$0xff]  }
  0x94   :  { %435 = vmatprep.subr.bf16.mxu1 %v1460_v36  ;;  %v1523_v36 = vld [vmem:[#allocation8 + $0x30] ss:$8 sps:$4 sm:$0xff]  }
  0x95   :  { %683 = vmatpush1.bf16.msra.mxu0 %v1499_v63 }
  0x96   :  { %684 = vmatprep.subr.bf16.mxu0 %v1504_v0 }
  0x97   :  { %436 = vmatpush1.bf16.msra.mxu1 %v1462_v37  ;;  %v1528_v37 = vld [vmem:[#allocation8 + $0x44] ss:$8 sps:$4 sm:$0xff]  }
  0x98   :  { %437 = vmatprep.subr.bf16.mxu1 %v1463_v38  ;;  %v1526_v38 = vld [vmem:[#allocation8 + $0x40] ss:$8 sps:$4 sm:$0xff]  }
  0x99   :  { %685 = vmatpush1.bf16.msra.mxu0 %v1502_v1 }
  0x9a   :  { %686 = vmatprep.subr.bf16.mxu0 %v1507_v2 }
  0x9b   :  { %438 = vmatpush1.bf16.msra.mxu1 %v1465_v39  ;;  %v1531_v39 = vld [vmem:[#allocation8 + $0x54] ss:$8 sps:$4 sm:$0xff]  }
  0x9c   :  { %913 = vmatprep.subr.bf16.mxu1 %v1516_v30 }
  0x9d   :  { %687 = vmatpush1.bf16.msra.mxu0 %v1505_v3 }
  0x9e   :  { %688 = vmatprep.subr.bf16.mxu0 %v1510_v25  ;;  %v1571_v25 = vld [vmem:[#allocation10 + $0x20] sm:$0xff]  }
  0xa1   :  { %689 = vmatpush1.bf16.msra.mxu0 %v1508_v26  ;;  %v1572_v26 = vld [vmem:[#allocation10 + $0x68] sm:$0xff]  }
  0xa2   :  { %690 = vmatprep.subr.bf16.mxu0 %v1513_v27  ;;  %v488_v27 = vld [vmem:[%s1989_s6] sm:$0x3] }
  0xa5   :  { %691 = vmatpush1.bf16.msra.mxu0 %v1511_v28  ;;  %v493_v28 = vrot.slane %v488_v27, %v1905_v6 }
 0x136   :  { %v188_v11 = vpop.f32.mrb[0].mxu0 }
 0x137   :  { %v189_v12 = vadd.f32 %v188_v11, %v123_v9  ;;  %v190_v13 = vpop.f32.mrb[1].mxu0 }
 0x138   :  { %v191_v14 = vadd.f32 %v190_v13, %v127_v10  ;;  %v192_v15 = vpop.f32.mrb[2].mxu0  ;;  %v1556_v13 = vld [vmem:[#allocation8 + $0xe0] ss:$8 sps:$4 sm:$0xff]  }
 0x139   :  { %v193_v16 = vadd.f32 %v192_v15, %v123_v9  ;;  %v194_v17 = vpop.f32.mrb[3].mxu0  ;;  %v197_v19 = vmax.f32 %v189_v12, 0.0  ;;  %v1558_v12 = vld [vmem:[#allocation8 + $0xe4] ss:$8 sps:$4 sm:$0xff]   ;;  %v1559_v15 = vld [vmem:[#allocation8 + $0xf0] ss:$8 sps:$4 sm:$0xff]  }
 0x13a   :  { %v195_v18 = vadd.f32 %v194_v17, %v127_v10  ;;  %v198_v21 = vmax.f32 %v191_v14, 0.0  ;;  %v1561_v14 = vld [vmem:[#allocation8 + $0xf4] ss:$8 sps:$4 sm:$0xff]   ;;  %v1563_v17 = vld [vmem:[#allocation10] sm:$0xff]  }
 0x13b   :  { %v199_v20 = vmax.f32 %v193_v16, 0.0  ;;  %v1562_v16 = vld [vmem:[#allocation10 + $0x40] sm:$0xff]  }
 0x13c   :  { %v200_v22 = vmax.f32 %v195_v18, 0.0  ;;  %v1564_v18 = vld [vmem:[#allocation10 + $0x48] sm:$0xff]   ;;  %1377 = vmatprep.subr.bf16.mxu0 %v1562_v16 }
 0x13d   :  { %v201_v23 = vpack.c.bf16 %v199_v20, %v197_v19  ;;  %v1565_v19 = vld [vmem:[#allocation10 + $0x8] sm:$0xff]   ;;  %v1566_v20 = vld [vmem:[#allocation10 + $0x50] sm:$0xff]  }
 0x13e   :  { %v202_v24 = vpack.c.bf16 %v200_v22, %v198_v21  ;;  %v1567_v21 = vld [vmem:[#allocation10 + $0x10] sm:$0xff]   ;;  %v1568_v22 = vld [vmem:[#allocation10 + $0x58] sm:$0xff]  }
 0x140   :  { %439 = vmatprep.mubr.bf16.mxu1 %v202_v24  ;;  %v1570_v24 = vld [vmem:[#allocation10 + $0x60] sm:$0xff]  }
 0x141   :  { %440 = vmatmul.mubr.bf16.vlgmr.msra.gmra.mrb[0].mxu1 %v201_v23  ;;  %v1569_v23 = vld [vmem:[#allocation10 + $0x18] sm:$0xff]  }
 0x142   :  { %914 = vmatpush1.bf16.msra.mxu1 %v1514_v29  ;;  %v497_v29 = vrot.slane %v488_v27, %v1910_v8 }
 0x143   :  { %915 = vmatprep.subr.bf16.mxu1 %v1519_v31 }
 0x146   :  { %916 = vmatpush1.bf16.msra.mxu1 %v1517_v32 }
 0x147   :  { %917 = vmatprep.subr.bf16.mxu1 %v1522_v33 }
 0x14a   :  { %918 = vmatpush1.bf16.msra.mxu1 %v1520_v34 }
 0x14b   :  { %919 = vmatprep.subr.bf16.mxu1 %v1525_v35 }
 0x14e   :  { %920 = vmatpush1.bf16.msra.mxu1 %v1523_v36 }
 0x14f   :  { %921 = vmatprep.subr.bf16.mxu1 %v1528_v37 }
 0x152   :  { %922 = vmatpush1.bf16.msra.mxu1 %v1526_v38 }
 0x153   :  { %923 = vmatprep.subr.bf16.mxu1 %v1531_v39 }
 0x156   :  { %924 = vmatpush1.bf16.msra.mxu1 %v1529_v40 }
 0x157   :  { %925 = vmatprep.subr.bf16.mxu1 %v1534_v41 }
 0x15a   :  { %926 = vmatpush1.bf16.msra.mxu1 %v1532_v42 }
 0x15b   :  { %927 = vmatprep.subr.bf16.mxu1 %v1537_v43 }
 0x15e   :  { %928 = vmatpush1.bf16.msra.mxu1 %v1535_v44  ;;  %v1573_v44 = vld [vmem:[#allocation10 + $0x28] sm:$0xff]  }
 0x15f   :  { %929 = vmatprep.subr.bf16.mxu1 %v1540_v45  ;;  %v1574_v45 = vld [vmem:[#allocation10 + $0x70] sm:$0xff]  }
 0x162   :  { %930 = vmatpush1.bf16.msra.mxu1 %v1538_v46  ;;  %v1575_v46 = vld [vmem:[#allocation10 + $0x30] sm:$0xff]  }
 0x163   :  { %931 = vmatprep.subr.bf16.mxu1 %v1543_v47  ;;  %v1576_v47 = vld [vmem:[#allocation10 + $0x78] sm:$0xff]  }
 0x166   :  { %932 = vmatpush1.bf16.msra.mxu1 %v1541_v48  ;;  %v1577_v48 = vld [vmem:[#allocation10 + $0x38] sm:$0xff]  }
 0x167   :  { %933 = vmatprep.subr.bf16.mxu1 %v1546_v49  ;;  %v1927_v49 = vld [vmem:[%s1994_s11] sm:$0xff] }
 0x168   :  { %1152 = vrot.lane.b32.xlu0 %v1927_v49, %s1742_s14 }
 0x16a   :  { %934 = vmatpush1.bf16.msra.mxu1 %v1544_v50  ;;  %v1934_v50 = vld [vmem:[%s1994_s11 + $0x8] sm:$0xff] }
 0x16b   :  { %935 = vmatprep.subr.bf16.mxu1 %v1549_v51  ;;  %v741_v51 = vld [vmem:[%s1991_s8] sm:$0x3] }
 0x16c   :  { %1154 = vrot.lane.b32.xlu0 %v1934_v50, %s1742_s14 }
 0x16e   :  { %936 = vmatpush1.bf16.msra.mxu1 %v1547_v52  ;;  %v746_v52 = vrot.slane %v741_v51, %v1905_v6  ;;  %v1358_v6 = vld [vmem:[%s1993_s10] ss:$0 sm:$0xff]  ;;  %s1746_s10 = smov [#allocation11]  }
 0x16f   :  { %937 = vmatprep.subr.bf16.mxu1 %v1552_v53  ;;  %v750_v53 = vrot.slane %v741_v51, %v1910_v8  ;;  %s1243_s24 = sshll.u32 %s1746_s10, 4  ;;  %s1244_s24 = int_to_ptr.vmem [resolvable:$true] %s1243_s24 }
 0x170   :  { %s1704_s26 = scalar_lea.vmem %s1244_s24, 256  ;;  %p1709_p13 = scmp.lt.s32.totalorder %s1244_s24, %s1244_s24 }
 0x171   :  { %p1705_p12 = scmp.ne.s32.totalorder %s1244_s24, %s1704_s26  ;;  %p1710_p0 = scmp.lt.s32.totalorder %s1704_s26, %s1704_s26 }
 0x172   :  { %938 = vmatpush1.bf16.msra.mxu1 %v1550_v54 }
 0x173   :  { %939 = vmatprep.subr.bf16.mxu1 %v1555_v55  ;;  %p1711_p1 = por %p1710_p0, %p1709_p13 }
 0x175   :  { %p1712_p2 = pnand %p1711_p1, %p1705_p12 }
 0x176   :  { %940 = vmatpush1.bf16.msra.mxu1 %v1553_v56 }
 0x177   :  { %941 = vmatprep.subr.bf16.mxu1 %v1558_v12 }
 0x17a   :  { %942 = vmatpush1.bf16.msra.mxu1 %v1556_v13 }
 0x17b   :  { %943 = vmatprep.subr.bf16.mxu1 %v1561_v14 }
 0x17e   :  { %944 = vmatpush1.bf16.msra.mxu1 %v1559_v15 }
 0x214   :  { %v441_v60 = vpop.f32.mrb[0].mxu1 }
 0x215   :  { %v442_v61 = vadd.f32 %v441_v60, %v240_v58  ;;  %v443_v62 = vpop.f32.mrb[1].mxu1 }
 0x216   :  { %v444_v63 = vadd.f32 %v443_v62, %v244_v59  ;;  %v445_v0 = vpop.f32.mrb[2].mxu1 }
 0x217   :  { %v446_v1 = vadd.f32 %v445_v0, %v240_v58  ;;  %v447_v2 = vpop.f32.mrb[3].mxu1  ;;  %v450_v4 = vmax.f32 %v442_v61, 0.0 }
 0x218   :  { %v448_v3 = vadd.f32 %v447_v2, %v244_v59  ;;  %v451_v7 = vmax.f32 %v444_v63, 0.0 }
 0x219   :  { %v452_v5 = vmax.f32 %v446_v1, 0.0 }
 0x21a   :  { %v453_v9 = vmax.f32 %v448_v3, 0.0 }
 0x21b   :  { %v454_v10 = vpack.c.bf16 %v452_v5, %v450_v4 }
 0x21c   :  { %v455_v11 = vpack.c.bf16 %v453_v9, %v451_v7 }
 0x21e   :  { %692 = vmatprep.mubr.bf16.mxu0 %v455_v11 }
 0x21f   :  { %693 = vmatmul.mubr.bf16.vlgmr.msra.gmra.mrb[4].mxu0 %v454_v10 }
 0x220   :  { %1378 = vmatpush3.bf16.msra.mxu0 %v1563_v17 }
 0x221   :  { %1379 = vmatprep.subr.bf16.mxu0 %v1564_v18 }
 0x224   :  { %1380 = vmatpush3.bf16.msra.mxu0 %v1565_v19 }
 0x225   :  { %1381 = vmatprep.subr.bf16.mxu0 %v1566_v20  ;;  %v1153_v20 = vpop.permute.xlu0 %1152 }
 0x228   :  { %1382 = vmatpush3.bf16.msra.mxu0 %v1567_v21 }
 0x229   :  { %1383 = vmatprep.subr.bf16.mxu0 %v1568_v22 }
 0x22c   :  { %1384 = vmatpush3.bf16.msra.mxu0 %v1569_v23  ;;  %v1745_v23 = vmov 0.0  }
 0x22d   :  { %1385 = vmatprep.subr.bf16.mxu0 %v1570_v24  ;;  %1142 = vst [vmem:[#allocation11] sm:$0xff] %v1745_v23  ;;  %1143 = vst [vmem:[#allocation11 + $0x8] sm:$0xff] %v1745_v23 }
 0x230   :  { %1386 = vmatpush3.bf16.msra.mxu0 %v1571_v25  ;;  %v1155_v25 = vpop.permute.xlu0 %1154 }
 0x231   :  { %1387 = vmatprep.subr.bf16.mxu0 %v1572_v26 }
 0x234   :  { %1388 = vmatpush3.bf16.msra.mxu0 %v1573_v44 }
 0x235   :  { %1389 = vmatprep.subr.bf16.mxu0 %v1574_v45 }
 0x238   :  { %1390 = vmatpush3.bf16.msra.mxu0 %v1575_v46  ;;  %v1204_v46 = vmul.f32 %v1934_v50, %v1934_v50 }
 0x239   :  { %1391 = vmatprep.subr.bf16.mxu0 %v1576_v47 }
 0x23a   :  { %v1206_v47 = vmul.f32 -0.5, %v1204_v46 }
 0x23c   :  { %1392 = vmatpush3.bf16.msra.mxu0 %v1577_v48 }
 0x2f2   :  { %v694_v30 = vpop.f32.mrb[4].mxu0 }
 0x2f3   :  { %v695_v31 = vadd.f32 %v694_v30, %v493_v28  ;;  %v696_v32 = vpop.f32.mrb[5].mxu0 }
 0x2f4   :  { %v697_v33 = vadd.f32 %v696_v32, %v497_v29  ;;  %v698_v34 = vpop.f32.mrb[6].mxu0 }
 0x2f5   :  { %v699_v35 = vadd.f32 %v698_v34, %v493_v28  ;;  %v700_v36 = vpop.f32.mrb[7].mxu0  ;;  %v703_v38 = vmax.f32 %v695_v31, 0.0 }
 0x2f6   :  { %v701_v37 = vadd.f32 %v700_v36, %v497_v29  ;;  %v704_v40 = vmax.f32 %v697_v33, 0.0 }
 0x2f7   :  { %v705_v39 = vmax.f32 %v699_v35, 0.0 }
 0x2f8   :  { %v706_v41 = vmax.f32 %v701_v37, 0.0 }
 0x2f9   :  { %v707_v42 = vpack.c.bf16 %v705_v39, %v703_v38 }
 0x2fa   :  { %v708_v43 = vpack.c.bf16 %v706_v41, %v704_v40 }
 0x2fc   :  { %945 = vmatprep.mubr.bf16.mxu1 %v708_v43 }
 0x2fd   :  { %946 = vmatmul.mubr.bf16.vlgmr.msra.gmra.mrb[4].mxu1 %v707_v42  ;;  %v1203_v42 = vmul.f32 %v1927_v49, %v1927_v49 }
 0x2ff   :  { %v1205_v45 = vmul.f32 -0.5, %v1203_v42 }
 0x3d0   :  { %v947_v54 = vpop.f32.mrb[4].mxu1 }
 0x3d1   :  { %v948_v55 = vadd.f32 %v947_v54, %v746_v52  ;;  %v949_v56 = vpop.f32.mrb[5].mxu1 }
 0x3d2   :  { %v950_v57 = vadd.f32 %v949_v56, %v750_v53  ;;  %v951_v58 = vpop.f32.mrb[6].mxu1 }
 0x3d3   :  { %v952_v59 = vadd.f32 %v951_v58, %v746_v52  ;;  %v953_v60 = vpop.f32.mrb[7].mxu1  ;;  %v956_v62 = vmax.f32 %v948_v55, 0.0 }
 0x3d4   :  { %v954_v61 = vadd.f32 %v953_v60, %v750_v53  ;;  %v957_v0 = vmax.f32 %v950_v57, 0.0 }
 0x3d5   :  { %v958_v63 = vmax.f32 %v952_v59, 0.0 }
 0x3d6   :  { %v959_v1 = vmax.f32 %v954_v61, 0.0 }
 0x3d7   :  { %v960_v2 = vpack.c.bf16 %v958_v63, %v956_v62 }
 0x3d8   :  { %v961_v3 = vpack.c.bf16 %v959_v1, %v957_v0 }
 0x3da   :  { %1129 = vmatprep.mubr.bf16.mxu0 %v961_v3 }
 0x3db   :  { %1130 = vmatmul.mubr.bf16.vlgmr.msra.gmra.mrb[8].mxu0 %v960_v2 }
 0x4ae   :  { %v1393_v4 = vpop.f32.mrb[8].mxu0 }
 0x4af   :  { %v1394_v8 = vpop.f32.mrb[9].mxu0 }
 0x4b0   :  { %v1395_v5 = vadd.f32 %v1394_v8, %v1393_v4  ;;  %v1396_v7 = vpop.f32.mrb[10].mxu0 }
 0x4b1   :  { %v1397_v9 = vpop.f32.mrb[11].mxu0 }
 0x4b2   :  { %v1132_v10 = vadd.f32 %v1395_v5, %v1358_v6  ;;  %v1398_v11 = vadd.f32 %v1397_v9, %v1396_v7 }
 0x4b4   :  { %1578 = vtanh.f32 %v1132_v10  ;;  %v1135_v12 = vadd.f32 %v1398_v11, %v1358_v6  ;;  %v1138_v13 = vmax.f32 %v1132_v10, -9.21 }
 0x4b6   :  { %v1139_v14 = vmax.f32 %v1135_v12, -9.21  ;;  %v1946_v15 = vmin.f32 %v1138_v13, 1.38 }
 0x4b8   :  { %v1948_v16 = vmin.f32 %v1139_v14, 1.38  ;;  %1207 = vrot.lane.b32.xlu0 %v1946_v15, %s1744_s7  ;;  %v1146_v17 = vmul.f32 1.442695, %v1946_v15 }
 0x4ba   :  { %1580 = vpow2.f32 %v1146_v17  ;;  %v1148_v18 = vmul.f32 1.442695, %v1948_v16 }
 0x4bc   :  { %1582 = vpow2.f32 %v1148_v18 }
 0x4bd   :  { %1584 = vtanh.f32 %v1135_v12 }
 0x4be   :  { %v1579_v19 = vpop.eup %1578 }
 0x4bf   :  { %1183 = vrot.lane.b32.xlu0 %v1579_v19, %s1742_s14 }
 0x4c4   :  { %v1581_v21 = vpop.eup %1580 }
 0x4c5   :  { %v1158_v22 = vmul.f32 %v1581_v21, %v1153_v20 }
 0x4c6   :  { %v1583_v24 = vpop.eup %1582 }
 0x4c7   :  { %1162 = vrot.lane.b32.xlu1 %v1158_v22, %s1744_s7  ;;  %v1159_v26 = vmul.f32 %v1583_v24, %v1155_v25  ;;  %v1585_v27 = vpop.eup %1584 }
 0x4cb   :  { %1164 = vrot.lane.b32.xlu1 %v1159_v26, %s1744_s7 }
 0x4cf   :  { %1209 = vrot.lane.b32.xlu1 %v1948_v16, %s1744_s7 }
 0x4d3   :  { %1185 = vrot.lane.b32.xlu1 %v1585_v27, %s1742_s14 }
 0x52a   :  { %v1208_v32 = vpop.permute.xlu0 %1207 }
 0x52b   :  { %v1213_v48 = vsub.f32 %v1205_v45, %v1208_v32 }
 0x52d   :  { %v1375_v52 = vadd.f32 -0.9189385, %v1213_v48 }
 0x531   :  { %v1184_v35 = vpop.permute.xlu0 %1183 }
 0x539   :  { %v1163_v28 = vpop.permute.xlu1 %1162 }
 0x53a   :  { %v1168_v29 = vadd.f32 %v1163_v28, %v1132_v10 }
 0x53c   :  { %1586 = vtanh.f32 %v1168_v29 }
 0x53d   :  { %v1165_v30 = vpop.permute.xlu1 %1164 }
 0x53e   :  { %v1169_v31 = vadd.f32 %v1165_v30, %v1135_v12 }
 0x540   :  { %1588 = vtanh.f32 %v1169_v31 }
 0x541   :  { %v1210_v33 = vpop.permute.xlu1 %1209 }
 0x542   :  { %v1214_v53 = vsub.f32 %v1206_v47, %v1210_v33 }
 0x544   :  { %v1376_v57 = vadd.f32 -0.9189385, %v1214_v53 }
 0x545   :  { %v1186_v39 = vpop.permute.xlu1 %1185 }
 0x546   :  { %v1587_v34 = vpop.eup %1586 }
 0x547   :  { %1175 = vst.msk [vmem:[#allocation11] sm:$0xff] %vm1174_vm1, %v1587_v34  ;;  %v1217_v36 = vmul.f32 %v1587_v34, %v1587_v34 }
 0x548   :  { %1190 = vst.msk [vmem:[#allocation11] sm:$0xff] %vm1189_vm2, %v1184_v35 }
 0x549   :  { %v1219_v37 = vsub.f32 1.0, %v1217_v36 }
 0x54a   :  { %v1589_v38 = vpop.eup %1588 }
 0x54b   :  { %1176 = vst.msk [vmem:[#allocation11 + $0x8] sm:$0xff] %vm1174_vm1, %v1589_v38  ;;  %v1221_v40 = vadd.f32 1e-06, %v1219_v37  ;;  %v1218_v41 = vmul.f32 %v1589_v38, %v1589_v38 }
 0x54c   :  { %1191 = vst.msk [vmem:[#allocation11 + $0x8] sm:$0xff] %vm1189_vm2, %v1186_v39 }
 0x54d   :  { %1590 = vlog2.f32 %v1221_v40  ;;  %v1220_v43 = vsub.f32 1.0, %v1218_v41 }
 0x54f   :  { %v1222_v44 = vadd.f32 1e-06, %v1220_v43 }
 0x551   :  { %1592 = vlog2.f32 %v1222_v44 }
 0x557   :  { %v1591_v51 = vpop.eup %1590 }
 0x558   :  { %v1224_v54 = vmul.f32 0.6931472, %v1591_v51 }
 0x55a   :  { %v1227_v55 = vsub.f32 %v1375_v52, %v1224_v54 }
 0x55b   :  { %v1593_v56 = vpop.eup %1592 }
 0x55c   :  { %v1229_v49 = vsel %vm1174_vm1, %v1227_v55, 0.0  ;;  %v1226_v58 = vmul.f32 0.6931472, %v1593_v56 }
 0x55d   :  { %1230 = vadd.xlane.f32.xlu0 %v1229_v49 }
 0x55e   :  { %v1228_v59 = vsub.f32 %v1376_v57, %v1226_v58 }
 0x560   :  { %v1232_v60 = vsel %vm1174_vm1, %v1228_v59, 0.0 }
 0x561   :  { %1233 = vadd.xlane.f32.xlu1 %v1232_v60 }
 0x572   :  { %1196 = vrot.lane.b32.xlu1 %v1948_v16, %s1742_s14 }
 0x573   :  { %1194 = vrot.lane.b32.xlu0 %v1946_v15, %s1742_s14 }
 0x5ea   :  { %v1231_v50 = vpop.xlane.xlu0 %1230 }
 0x5ee   :  { %v1195_v61 = vpop.permute.xlu0 %1194  ;;  %v1234_v62 = vpop.xlane.xlu1 %1233 }
 0x5ef   :  { %1201 = vst.msk [vmem:[#allocation11] sm:$0xff] %vm1200_vm3, %v1195_v61 }
 0x5f0   :  { %1236 = vst.msk [vmem:[#allocation11] sm:$0xff] %vm1235_vm4, %v1231_v50 }
 0x5f2   :  { %v1197_v63 = vpop.permute.xlu1 %1196 }
 0x5f3   :  { %1202 = vst.msk [vmem:[#allocation11 + $0x8] sm:$0xff] %vm1200_vm3, %v1197_v63 }
 0x5f4   :  { %1237 = vst.msk [vmem:[#allocation11 + $0x8] sm:$0xff] %vm1235_vm4, %v1234_v62 }
 0x5f5   :  { %1715 = shalt.err (!%p1712_p2)
}
 0x5f6   :  { %s1716_s5 = scalar_lea.hbm %s1995_s12, 256 }
 0x5f7   :  { %p1717_p3 = scmp.ne.s32.totalorder %s1995_s12, %s1716_s5  ;;  %p1720_p4 = scmp.lt.u32.totalorder %s1716_s5, %s1995_s12 }
 0x5f9   :  { %p1722_p5 = pnand %p1720_p4, %p1717_p3 }
 0x5fb   :  { %1725 = shalt.err (!%p1722_p5)
}
 0x5fc   :  { %1249 = dma.vmem_to_hbm [thread:$0]  %s1244_s24, 256, %s1995_s12, [#allocation4], %s1736_s15, %s1736_s15, %s1737_s16  }
 0x5fd   :  { %1732 = dma.done.wait [#allocation4], 256  }
 0x5fe   :  { %1733 = vsyncadd [#allocation4], 4294967040 }
 0x5ff   :  { %1253 = vsyncpa [#allocation3], 1 }
 0x600   :  { %1254 = vsyncpa [#allocation6], 1 }
 0x601   :  { %1255 = vsyncpa [#allocation9], 1 }
 0x602   :  { %1256 = vsyncpa [#allocation4], 1 }

</bundles_post_ra>
